<compile_context>
chip_gen: v6e
topology: v6e:2x2x1
jax: 0.10.0
libtpu: 0.0.40
codegen_flags: <defaults>
</compile_context>

<pallas_src>
import math

import jax
import jax.numpy as jnp
import numpy as np
from jax.experimental import pallas as pl
from jax.experimental.pallas import tpu as pltpu


def _vdiffusion_kernel(absig_ref,                         # SMEM (3, B): [alpha; beta; sigma]
                       x_ref, n_ref,                      # (C, BLK) lane-dense tiles
                       w1_ref, b1e_ref, w2_ref, b2_ref,   # (H, C), (H, 2)=[b1|emb], (C, H), (C, 1)
                       out_ref):                          # (C, 128) per-block partial sq.err.
    b = pl.program_id(0)
    alpha = absig_ref[0, b]          # per-batch scalars from SMEM (no per-column stream)
    beta = absig_ref[1, b]
    sig = absig_ref[2, b]

    x = x_ref[...]
    noise = n_ref[...]

    x_noisy = x * alpha + noise * beta
    x_target = noise * alpha - x * beta

    # Synthetic denoiser net: channel-mixing MLP with sigma-FiLM bias.
    # Lane-dense MXU matmuls: (H,C) x (C,BLK) and (C,H) x (H,BLK) -> one push per block.
    h = jnp.dot(w1_ref[...], x_noisy, preferred_element_type=jnp.float32)
    h = h + b1e_ref[:, 0:1] + b1e_ref[:, 1:2] * sig
    h = jnp.maximum(h, 0.0)
    y = jnp.dot(w2_ref[...], h, preferred_element_type=jnp.float32) + b2_ref[...]

    d = y - x_target
    d2 = d * d

    # Fold BLK lanes into one 128-lane partial-sum tile with a TREE of VPU adds
    # (log-depth critical path, no cross-lane reduce, full-tile unmasked store).
    c, blk = d2.shape
    parts = [d2[:, k * 128:(k + 1) * 128] for k in range(blk // 128)]
    while len(parts) > 1:
        nxt = [parts[i] + parts[i + 1] for i in range(0, len(parts) - 1, 2)]
        if len(parts) % 2:
            nxt.append(parts[-1])
        parts = nxt
    out_ref[...] = parts[0]


def _pick_block_cols(T, C, H, max_block_bytes=3 << 20):
    """Largest multiple of 128 dividing T whose full per-block VMEM footprint fits the budget.

    Budgets the true footprint: 2 input streams x 2 pipeline buffers x C rows, plus in-body
    intermediates (x_noisy, x_target, y, d, d2 ~ 5C rows; h ~ H rows), all f32.
    """
    per_col_bytes = (2 * 2 * C + 5 * C + H) * 4
    limit = max(128, (max_block_bytes // per_col_bytes) // 128 * 128)
    best = 128
    blk = 128
    while blk <= min(T, limit):
        if T % blk == 0:
            best = blk
        blk += 128
    return best


def vdiffusion_loss(x, noise, sigmas, params, *, block_cols=None):
    """Scalar v-diffusion MSE loss computed by a single Pallas kernel.

    x, noise: (B, C, T) float32.  sigmas: (B,) float32.
    params = (w1 (H,C), b1 (H,1), emb (H,1), w2 (C,H), b2 (C,1)).
    """
    B, C, T = x.shape
    w1, b1, emb, w2, b2 = params
    H = w1.shape[0]

    assert T % 128 == 0, "T must be a multiple of 128 (lane width)"
    if block_cols is None:
        block_cols = _pick_block_cols(T, C, H)
    assert block_cols % 128 == 0 and T % block_cols == 0
    num_t_blocks = T // block_cols

    # Per-batch alpha/beta/sigma computed once in the wrapper (B transcendentals total),
    # delivered to the kernel as a tiny SMEM table via scalar prefetch.
    angle = sigmas.astype(jnp.float32) * (math.pi / 2.0)
    absig = jnp.stack([jnp.cos(angle), jnp.sin(angle), sigmas.astype(jnp.float32)], axis=0)  # (3, B)

    b1e = jnp.concatenate([b1, emb], axis=1)                      # (H, 2): packed tiny constants

    partials = pl.pallas_call(
        _vdiffusion_kernel,
        out_shape=jax.ShapeDtypeStruct((B, num_t_blocks, C, 128), jnp.float32),
        grid_spec=pltpu.PrefetchScalarGridSpec(
            num_scalar_prefetch=1,                                # absig -> SMEM
            grid=(B, num_t_blocks),
            in_specs=[
                # x / noise read straight from their native (B, C, T) layout: no wrapper
                # transpose/reshape, kernel still sees a lane-dense (C, BLK) tile.
                pl.BlockSpec((None, C, block_cols), lambda b, j, absig: (b, 0, j)),
                pl.BlockSpec((None, C, block_cols), lambda b, j, absig: (b, 0, j)),
                pl.BlockSpec((H, C), lambda b, j, absig: (0, 0)),   # w1 (resident)
                pl.BlockSpec((H, 2), lambda b, j, absig: (0, 0)),   # [b1 | emb]
                pl.BlockSpec((C, H), lambda b, j, absig: (0, 0)),   # w2
                pl.BlockSpec((C, 1), lambda b, j, absig: (0, 0)),   # b2
            ],
            out_specs=pl.BlockSpec((None, None, C, 128),
                                   lambda b, j, absig: (b, j, 0, 0)),
        ),
        compiler_params=pltpu.CompilerParams(
            # Each grid step owns its output block -> no accumulator, no race; both axes
            # can be sharded across TensorCores on v7x (no-op on v5e/v6e).
            dimension_semantics=("parallel", "parallel"),
            vmem_limit_bytes=48 * 1024 * 1024,   # under v7x's 64 MiB physical VMEM
        ),
    )(absig, x, noise, w1, b1e, w2, b2)

    return jnp.sum(partials) / (B * C * T)


def _reference_loss(x, noise, sigmas, params):
    """Pure-JAX reference mirroring the PyTorch VDiffusion.forward."""
    w1, b1, emb, w2, b2 = params
    sig = sigmas[:, None, None]
    alpha = jnp.cos(sig * math.pi / 2.0)
    beta = jnp.sin(sig * math.pi / 2.0)
    x_noisy = x * alpha + noise * beta
    x_target = noise * alpha - x * beta
    h = jnp.einsum("hc,bct->bht", w1, x_noisy) + b1[None] + emb[None] * sig
    h = jnp.maximum(h, 0.0)
    y = jnp.einsum("ch,bht->bct", w2, h) + b2[None]
    return jnp.mean((y - x_target) ** 2)


if __name__ == "__main__":
    B, C, T, H = 4, 8, 512, 32   # small, TPU-tile-aligned (C -> sublanes, T -> lanes)

    key = jax.random.PRNGKey(0)
    kx, kn, ks, k1, k2, k3, k4, k5 = jax.random.split(key, 8)

    x = jax.random.normal(kx, (B, C, T), dtype=jnp.float32)
    noise = jax.random.normal(kn, (B, C, T), dtype=jnp.float32)
    # sigma_distribution -> UniformDistribution(0, 1), sampled deterministically
    sigmas = jax.random.uniform(ks, (B,), dtype=jnp.float32)

    # deterministic synthetic "net" parameters (2-layer channel MLP with sigma bias)
    w1 = 0.1 * jax.random.normal(k1, (H, C), dtype=jnp.float32)
    b1 = 0.1 * jax.random.normal(k2, (H, 1), dtype=jnp.float32)
    emb = 0.1 * jax.random.normal(k3, (H, 1), dtype=jnp.float32)
    w2 = 0.1 * jax.random.normal(k4, (C, H), dtype=jnp.float32)
    b2 = 0.1 * jax.random.normal(k5, (C, 1), dtype=jnp.float32)
    params = (w1, b1, emb, w2, b2)

    # block_cols=256 -> 2-D grid (4, 2) at these toy sizes (exercises multi-block + the
    # lane fold); at real sizes the auto-picker chooses the largest T-divisor fitting the
    # budgeted VMEM footprint (256-lane multiples, MXU-width friendly).
    loss = jax.block_until_ready(vdiffusion_loss(x, noise, sigmas, params, block_cols=256))
    ref = jax.block_until_ready(_reference_loss(x, noise, sigmas, params))

    np.testing.assert_allclose(np.asarray(loss), np.asarray(ref), rtol=1e-5, atol=1e-5)
    print("KERNEL_OK")
</pallas_src>

<mosaic_0001>
module attributes {stable_mosaic.version = 11 : i64} {
  func.func @_vdiffusion_kernel(%arg0: i32, %arg1: i32, %arg2: memref<3x4xf32, #tpu.memory_space<smem>>, %arg3: memref<1x8x256xf32, #tpu.memory_space<vmem>>, %arg4: memref<1x8x256xf32, #tpu.memory_space<vmem>>, %arg5: memref<32x8xf32, #tpu.memory_space<vmem>>, %arg6: memref<32x2xf32, #tpu.memory_space<vmem>>, %arg7: memref<8x32xf32, #tpu.memory_space<vmem>>, %arg8: memref<8x1xf32, #tpu.memory_space<vmem>>, %arg9: memref<1x1x8x128xf32, #tpu.memory_space<vmem>>) attributes {dimension_semantics = [#tpu.dimension_semantics<parallel>, #tpu.dimension_semantics<parallel>], iteration_bounds = array<i64: 4, 2>, scalar_prefetch = 1 : i64, scratch_operands = 0 : i64, tpu.core_type = #tpu.core_type<tc>, window_params = [{transform_indices = @transform_0, window_bounds = array<i64: 1, 8, 256>}, {transform_indices = @transform_1, window_bounds = array<i64: 1, 8, 256>}, {pipeline_mode = #tpu.pipeline_mode<synchronous>, transform_indices = @transform_2, window_bounds = array<i64: 32, 8>}, {pipeline_mode = #tpu.pipeline_mode<synchronous>, transform_indices = @transform_3, window_bounds = array<i64: 32, 2>}, {pipeline_mode = #tpu.pipeline_mode<synchronous>, transform_indices = @transform_4, window_bounds = array<i64: 8, 32>}, {pipeline_mode = #tpu.pipeline_mode<synchronous>, transform_indices = @transform_5, window_bounds = array<i64: 8, 1>}, {transform_indices = @transform_6, window_bounds = array<i64: 1, 1, 8, 128>}]} {
    %c0 = arith.constant 0 : index
    %0 = arith.index_cast %arg0 : i32 to index
    %1 = memref.load %arg2[%c0, %0] : memref<3x4xf32, #tpu.memory_space<smem>>
    %c1 = arith.constant 1 : index
    %2 = arith.index_cast %arg0 : i32 to index
    %3 = memref.load %arg2[%c1, %2] : memref<3x4xf32, #tpu.memory_space<smem>>
    %c2 = arith.constant 2 : index
    %4 = arith.index_cast %arg0 : i32 to index
    %5 = memref.load %arg2[%c2, %4] : memref<3x4xf32, #tpu.memory_space<smem>>
    %c0_0 = arith.constant 0 : index
    %c0_1 = arith.constant 0 : index
    %c0_2 = arith.constant 0 : index
    %6 = vector.load %arg3[%c0_0, %c0_1, %c0_2] : memref<1x8x256xf32, #tpu.memory_space<vmem>>, vector<1x8x256xf32>
    %7 = vector.shape_cast %6 : vector<1x8x256xf32> to vector<8x256xf32>
    %c0_3 = arith.constant 0 : index
    %c0_4 = arith.constant 0 : index
    %c0_5 = arith.constant 0 : index
    %8 = vector.load %arg4[%c0_3, %c0_4, %c0_5] : memref<1x8x256xf32, #tpu.memory_space<vmem>>, vector<1x8x256xf32>
    %9 = vector.shape_cast %8 : vector<1x8x256xf32> to vector<8x256xf32>
    %10 = vector.broadcast %1 : f32 to vector<8x256xf32>
    %11 = arith.mulf %7, %10 : vector<8x256xf32>
    %12 = vector.broadcast %3 : f32 to vector<8x256xf32>
    %13 = arith.mulf %9, %12 : vector<8x256xf32>
    %14 = arith.addf %11, %13 : vector<8x256xf32>
    %15 = vector.broadcast %1 : f32 to vector<8x256xf32>
    %16 = arith.mulf %9, %15 : vector<8x256xf32>
    %17 = vector.broadcast %3 : f32 to vector<8x256xf32>
    %18 = arith.mulf %7, %17 : vector<8x256xf32>
    %19 = arith.subf %16, %18 : vector<8x256xf32>
    %c0_6 = arith.constant 0 : index
    %c0_7 = arith.constant 0 : index
    %20 = vector.load %arg5[%c0_6, %c0_7] : memref<32x8xf32, #tpu.memory_space<vmem>>, vector<32x8xf32>
    %cst = arith.constant dense<0.000000e+00> : vector<32x256xf32>
    %21 = tpu.matmul %20, %14, %cst {dimension_numbers = #tpu.dot_dimension_numbers<[1], [0], [0], [1], [0, 0, 1, 1], [], []>} : vector<32x8xf32>, vector<8x256xf32>, vector<32x256xf32> -> vector<32x256xf32>
    %c0_8 = arith.constant 0 : index
    %c0_9 = arith.constant 0 : index
    %22 = vector.load %arg6[%c0_8, %c0_9] : memref<32x2xf32, #tpu.memory_space<vmem>>, vector<32x1xf32>
    %23 = vector.broadcast %22 : vector<32x1xf32> to vector<32x256xf32>
    %24 = arith.addf %21, %23 : vector<32x256xf32>
    %c0_10 = arith.constant 0 : index
    %c1_11 = arith.constant 1 : index
    %25 = vector.load %arg6[%c0_10, %c1_11] : memref<32x2xf32, #tpu.memory_space<vmem>>, vector<32x1xf32>
    %26 = vector.broadcast %5 : f32 to vector<32x1xf32>
    %27 = arith.mulf %25, %26 : vector<32x1xf32>
    %28 = vector.broadcast %27 : vector<32x1xf32> to vector<32x256xf32>
    %29 = arith.addf %24, %28 : vector<32x256xf32>
    %cst_12 = arith.constant 0.000000e+00 : f32
    %30 = vector.broadcast %cst_12 : f32 to vector<32x256xf32>
    %31 = arith.maximumf %29, %30 : vector<32x256xf32>
    %c0_13 = arith.constant 0 : index
    %c0_14 = arith.constant 0 : index
    %32 = vector.load %arg7[%c0_13, %c0_14] : memref<8x32xf32, #tpu.memory_space<vmem>>, vector<8x32xf32>
    %cst_15 = arith.constant dense<0.000000e+00> : vector<8x256xf32>
    %33 = tpu.matmul %32, %31, %cst_15 {dimension_numbers = #tpu.dot_dimension_numbers<[1], [0], [0], [1], [0, 0, 1, 1], [], []>} : vector<8x32xf32>, vector<32x256xf32>, vector<8x256xf32> -> vector<8x256xf32>
    %c0_16 = arith.constant 0 : index
    %c0_17 = arith.constant 0 : index
    %34 = vector.load %arg8[%c0_16, %c0_17] : memref<8x1xf32, #tpu.memory_space<vmem>>, vector<8x1xf32>
    %35 = vector.broadcast %34 : vector<8x1xf32> to vector<8x256xf32>
    %36 = arith.addf %33, %35 : vector<8x256xf32>
    %37 = arith.subf %36, %19 : vector<8x256xf32>
    %38 = arith.mulf %37, %37 : vector<8x256xf32>
    %39 = vector.extract_strided_slice %38 {offsets = [0, 0], sizes = [8, 128], strides = [1, 1]} : vector<8x256xf32> to vector<8x128xf32>
    %40 = vector.extract_strided_slice %38 {offsets = [0, 128], sizes = [8, 128], strides = [1, 1]} : vector<8x256xf32> to vector<8x128xf32>
    %41 = arith.addf %39, %40 : vector<8x128xf32>
    %c0_18 = arith.constant 0 : index
    %c0_19 = arith.constant 0 : index
    %c0_20 = arith.constant 0 : index
    %c0_21 = arith.constant 0 : index
    %42 = vector.load %arg9[%c0_18, %c0_19, %c0_20, %c0_21] : memref<1x1x8x128xf32, #tpu.memory_space<vmem>>, vector<1x1x8x128xf32>
    %43 = vector.shape_cast %42 : vector<1x1x8x128xf32> to vector<8x128xf32>
    %44 = vector.shape_cast %41 : vector<8x128xf32> to vector<1x1x8x128xf32>
    tpu.vector_store %arg9[%c0_18, %c0_19, %c0_20, %c0_21], %44 {strides = array<i32>} : memref<1x1x8x128xf32, #tpu.memory_space<vmem>>, vector<1x1x8x128xf32>,
    return
  }
  func.func @transform_0(%arg0: i32, %arg1: i32, %arg2: memref<3x4xf32, #tpu.memory_space<smem>>) -> (i32, i32, i32) {
    %c0_i32 = arith.constant 0 : i32
    %c0_i32_0 = arith.constant 0 : i32
    return %arg0, %c0_i32, %arg1 : i32, i32, i32
  }
  func.func @transform_1(%arg0: i32, %arg1: i32, %arg2: memref<3x4xf32, #tpu.memory_space<smem>>) -> (i32, i32, i32) {
    %c0_i32 = arith.constant 0 : i32
    %c0_i32_0 = arith.constant 0 : i32
    return %arg0, %c0_i32, %arg1 : i32, i32, i32
  }
  func.func @transform_2(%arg0: i32, %arg1: i32, %arg2: memref<3x4xf32, #tpu.memory_space<smem>>) -> (i32, i32) {
    %c0_i32 = arith.constant 0 : i32
    %c0_i32_0 = arith.constant 0 : i32
    %c0_i32_1 = arith.constant 0 : i32
    return %c0_i32, %c0_i32_0 : i32, i32
  }
  func.func @transform_3(%arg0: i32, %arg1: i32, %arg2: memref<3x4xf32, #tpu.memory_space<smem>>) -> (i32, i32) {
    %c0_i32 = arith.constant 0 : i32
    %c0_i32_0 = arith.constant 0 : i32
    %c0_i32_1 = arith.constant 0 : i32
    return %c0_i32, %c0_i32_0 : i32, i32
  }
  func.func @transform_4(%arg0: i32, %arg1: i32, %arg2: memref<3x4xf32, #tpu.memory_space<smem>>) -> (i32, i32) {
    %c0_i32 = arith.constant 0 : i32
    %c0_i32_0 = arith.constant 0 : i32
    %c0_i32_1 = arith.constant 0 : i32
    return %c0_i32, %c0_i32_0 : i32, i32
  }
  func.func @transform_5(%arg0: i32, %arg1: i32, %arg2: memref<3x4xf32, #tpu.memory_space<smem>>) -> (i32, i32) {
    %c0_i32 = arith.constant 0 : i32
    %c0_i32_0 = arith.constant 0 : i32
    %c0_i32_1 = arith.constant 0 : i32
    return %c0_i32, %c0_i32_0 : i32, i32
  }
  func.func @transform_6(%arg0: i32, %arg1: i32, %arg2: memref<3x4xf32, #tpu.memory_space<smem>>) -> (i32, i32, i32, i32) {
    %c0_i32 = arith.constant 0 : i32
    %c0_i32_0 = arith.constant 0 : i32
    %c0_i32_1 = arith.constant 0 : i32
    return %arg0, %arg1, %c0_i32, %c0_i32_0 : i32, i32, i32, i32
  }
}

</mosaic_0001>

<bundles_post_ra>
// kernel: tpu_custom_call.1
= control target key start
LH: loop header
LB: loop body
LE: loop exit
PB: predicated region body
PF: predicated region fallthrough
CT: control target
= control target key end

     0   :  { %s1339_s0 = inlined_call_operand.vmem [shape: f32[3,4], index: 0, kind: input, shape index: {}]   ;;  %s1340_s1 = inlined_call_operand.hbm [shape: f32[4,8,512], index: 1, kind: input, shape index: {}]   ;;  %s1341_s2 = inlined_call_operand.hbm [shape: f32[4,8,512], index: 2, kind: input, shape index: {}]   ;;  %s1342_s3 = inlined_call_operand.vmem [shape: f32[32,8], index: 3, kind: input, shape index: {}]   ;;  %s1343_s4 = inlined_call_operand.vmem [shape: f32[32,2], index: 4, kind: input, shape index: {}]   ;;  %s1344_s5 = inlined_call_operand.vmem [shape: f32[8,32], index: 5, kind: input, shape index: {}]   ;;  %s1345_s6 = inlined_call_operand.vmem [shape: f32[8,1], index: 6, kind: input, shape index: {}]   ;;  %s1346_s7 = inlined_call_operand.hbm [shape: f32[4,2,8,128], index: 7, kind: output, shape index: {}]  }
   0x1   :  { %1351 = sst [smem:[#allocation18_spill]] %s1340_s1  ;;  %s12_s26 = sshll.u32 %s1339_s0, 4  ;;  %s13_s26 = int_to_ptr.vmem [resolvable:$true] %s12_s26 }
   0x2   :  { %s880_s27 = scalar_lea.vmem %s13_s26, 64  ;;  %p885_p1 = scmp.lt.s32.totalorder %s13_s26, %s13_s26 }
   0x3   :  { %p881_p0 = scmp.ne.s32.totalorder %s13_s26, %s880_s27  ;;  %p886_p2 = scmp.lt.s32.totalorder %s880_s27, %s880_s27 }
   0x5   :  { %p887_p3 = por %p886_p2, %p885_p1 }
   0x7   :  { %p888_p4 = pnand %p887_p3, %p881_p0 }
   0x9   :  { %891 = shalt.err (!%p888_p4)  }
   0xa   :  { %s1052_s28 = smov [#allocation3]  }
   0xb   :  { %15 = dma.vmem_to_smem %s13_s26, 64, %s1052_s28, [#allocation2] }
   0xc   :  { %1006 = dma.done.wait [#allocation2], 64 }
   0xd   :  { %1007 = vsyncadd [#allocation2], 4294967232 }
   0xe   :  { %17 = sfence }
   0xf   :  { %18 = vsyncpa [#allocation5], 0 }
  0x10   :  { %20 = vsyncpa [#allocation5 + $0x1], 0 }
  0x11   :  { %21 = vsyncpa [#allocation8], 0 }
  0x12   :  { %23 = vsyncpa [#allocation8 + $0x1], 0 }
  0x13   :  { %24 = vsyncpa [#allocation6], 0 }
  0x14   :  { %26 = vsyncpa [#allocation6 + $0x1], 0  ;;  %s1102_s0 = smov 0   ;;  %s1104_s29 = smov 0  }
  0x15   :  { %s1106_s30 = smov 0   ;;  %s1108_s8 = smov 0  }
  0x16   :  { %s1110_s9 = smov 0   ;;  %s1112_s10 = smov 0  }
  0x17   :  { %s1114_s11 = smov 0   ;;  %s1116_s12 = smov 0  }
  0x18 LB: > { %1352 = sst [smem:[#allocation14_spill]] %s1046_s11  ;;  %s755_s13 = sadd.s32 4294967295, %s1050_s12   ;;  %s1050_s12 = sphi %s1116_s12, %s32_s12   ;;  %s1046_s11 = sphi %s1114_s11, %s1366_s11   ;;  %s1042_s10 = sphi %s1112_s10, %s1371_s10   ;;  %s1038_s9 = sphi %s1110_s9, %s1364_s9   ;;  %s1034_s8 = sphi %s1108_s8, %s1370_s8   ;;  %s1030_s30 = sphi %s1106_s30, %s1369_s30   ;;  %s1026_s29 = sphi %s1104_s29, %s1368_s29   ;;  %s1022_s0 = sphi %s1102_s0, %s1367_s0  }
  0x19   : > { %s756_s14 = sadd.s32 4294967294, %s1050_s12   ;;  %s41_s15 = sadd.s32 1, %s1042_s10 }
  0x1a   : > { %s44_s16 = sadd.s32 1, %s1046_s11  ;;  %p42_p5 = scmp.ge.s32.totalorder %s41_s15, 2 }
  0x1b   : > { %s53_s17 = sadd.s32 1, %s1030_s30  ;;  %p60_p6 = scmp.ne.s32.totalorder %s1030_s30, %s1026_s29 }
  0x1c   : > { %p61_p7 = scmp.eq.s32.totalorder %s1050_s12, 0  ;;  %s1373_s15 = smov (%p42_p5, %s41_s15), 0 }
  0x1d   : > { %1353 = sst [smem:[#allocation15_spill]] %s1373_s15  ;;  %s1375_s16 = smov (!%p42_p5, %s44_s16), %s1046_s11 }
  0x1e   : > { %s49_s18 = ssub.s32 %s1042_s10, %s1373_s15  ;;  %p1155_p8 = por %p61_p7, %p60_p6 }
  0x1f   : > { %p46_p9 = scmp.ge.s32.totalorder %s1375_s16, 4  ;;  %p66_p10 = scmp.ne.s32.totalorder %s1026_s29, %s1022_s0 }
  0x20   : > { %p67_p11 = scmp.eq.s32.totalorder %s755_s13, 0  ;;  %p204_p12 = scmp.eq.s32.totalorder %s755_s13, 7 }
  0x21   : > { %s1377_s16 = smov (%p46_p9, %s1375_s16), 0  ;;  %p210_p1 = scmp.eq.s32.totalorder %s756_s14, 7 }
  0x22   : > { %1355 = sst [smem:[#allocation16_spill]] %s1377_s16  ;;  %p1163_p13 = por %p67_p11, %p66_p10 }
  0x23   : > { %p1167_p0 = por %p204_p12, %p60_p6  ;;  %s48_s22 = ssub.s32 %s1046_s11, %s1377_s16 }
  0x24   : > { %s50_s23 = sor.u32 %s49_s18, %s48_s22  ;;  %p1173_p3 = por %p210_p1, %p66_p10 }
  0x25   : > { %p51_p2 = scmp.eq.s32.totalorder %s50_s23, 0  ;;  %p804_p4 = scmp.lt.s32.totalorder %s1050_s12, 8 }
  0x26   : > { %s1358_s24 = scalar_select %p1173_p3, 1, 0 }
  0x27   : > { %s1179_s25 = sand.u32 1, %s1030_s30   ;;  %s760_s28 = sshll.u32 %s1042_s10, 1 }
  0x28   : > { %1359 = sst [smem:[#allocation17_spill]] %s1358_s24  ;;  %s759_s27 = sshll.u32 %s1179_s25, 4 }
  0x29   : > { %s1182_s26 = scalar_select %p51_p2, %s1030_s30, %s53_s17  }
  0x2a   : > { %s761_s13 = sshll.u32 %s1046_s11, 2  ;;  %s246_s14 = scalar_lea.vmem [#allocation4], %s759_s27 }
  0x2b   : > { %s256_s18 = sshll.u32 %s246_s14, 4  ;;  %s252_s22 = sadd.s32 %s761_s13, %s760_s28  ;;  %s257_s18 = int_to_ptr.vmem [resolvable:$true] %s256_s18 }
  0x2c   : > { %s762_s23 = sshll.u32 %s252_s22, 7  ;;  %p1191_p5 = pnand %p804_p4, %p1155_p8 }
  0x2d   : > { %s1361_s1 = sld [smem:[#allocation18_spill]]  ;;  %p767_p6 = scmp.ge.s32.totalorder %s1050_s12, 1 }
  0x2e   : > { %p282_p7 = scmp.lt.s32.totalorder %s1050_s12, 9  ;;  %s243_s11 = scalar_lea.sflag [#allocation5], %s1179_s25 }
  0x2f   : > { %p894_p9 = pneg %p1191_p5  ;;  %s905_s14 = scalar_lea.vmem %s257_s18, 256 }
  0x30   : > { %p906_p10 = scmp.ne.s32.totalorder %s257_s18, %s905_s14  ;;  %s1053_s19 = smov [#allocation4]  }
  0x31   : > { %s910_s28 = sshll.u32 %s1053_s19, 4  ;;  %s911_s28 = int_to_ptr.vmem [resolvable:$false] %s910_s28 }
  0x32   : > { %p908_p11 = pnand %p906_p10, %p894_p9  ;;  %s912_s13 = scalar_lea.vmem %s911_s28, 512 }
  0x33   : > { %s254_s17 = scalar_lea.hbm %s1361_s1, %s762_s23  ;;  %p913_p12 = scmp.lt.s32.totalorder %s257_s18, %s911_s28 }
  0x34   : > { %p909_p8 = pneg %p908_p11  ;;  %p914_p1 = scmp.lt.s32.totalorder %s912_s13, %s905_s14 }
  0x36   : > { %p915_p2 = por %p914_p1, %p913_p12 }
  0x38   : > { %p916_p4 = pnand %p915_p2, %p909_p8 }
  0x3a   : > { %919 = shalt.err (!%p916_p4)
}
  0x3b   : > { %796 = dma.hbm_to_vmem [thread:$0]  (!%p1191_p5), %s254_s17, 256, %s257_s18, %s243_s11  }
  0x3c   : > { %p1212_p10 = pnand %p767_p6, %p282_p7  ;;  %s275_s14 = scalar_lea.hbm %s1341_s2, %s762_s23 }
  0x3d   : > { %s267_s19 = scalar_lea.vmem [#allocation7], %s759_s27  ;;  %s264_s13 = scalar_lea.sflag [#allocation8], %s1179_s25 }
  0x3e   : > { %s277_s28 = sshll.u32 %s267_s19, 4  ;;  %s1054_s11 = smov [#allocation7]   ;;  %s278_s28 = int_to_ptr.vmem [resolvable:$true] %s277_s28 }
  0x3f   : > { %s933_s1 = scalar_lea.vmem %s278_s28, 256  ;;  %s938_s18 = sshll.u32 %s1054_s11, 4  ;;  %s939_s18 = int_to_ptr.vmem [resolvable:$false] %s938_s18 }
  0x40   : > { %p934_p11 = scmp.ne.s32.totalorder %s278_s28, %s933_s1  ;;  %s940_s17 = scalar_lea.vmem %s939_s18, 512 }
  0x41   : > { %p941_p6 = scmp.lt.s32.totalorder %s278_s28, %s939_s18  ;;  %p942_p7 = scmp.lt.s32.totalorder %s940_s17, %s933_s1 }
  0x42   : > { %p936_p8 = pnand %p934_p11, %p894_p9 }
  0x43   : > { %p943_p1 = por %p942_p7, %p941_p6 }
  0x44   : > { %p937_p12 = pneg %p936_p8 }
  0x46   : > { %p944_p2 = pnand %p943_p1, %p937_p12 }
  0x48   : > { %947 = shalt.err (!%p944_p2)
}
  0x49   : > { %799 = dma.hbm_to_vmem [thread:$0]  (!%p1191_p5), %s275_s14, 256, %s278_s28, %s264_s13  }
  0x4a   : > { %286 = sbr.rel (%p1212_p10) target bundleno = 536 (0x218), region = 44  ;;  %s1230_s25 = sand.u32 (!%p1212_p10), 1, %s1026_s29  }
  0x4b   : > { %s768_s27 = sshll.u32 (!%p1212_p10), %s1230_s25, 4  ;;  %s289_s23 = scalar_lea.sflag (!%p1212_p10), [#allocation5], %s1230_s25 }
  0x4c   : > { %s292_s24 = scalar_lea.vmem (!%p1212_p10), [#allocation4], %s768_s27 }
  0x4f   : > { %1009 = dma.done.wait (%p1163_p13), %s289_s23, 256  }
  0x50   : > { %1011 = vsyncadd (%p1163_p13), %s289_s23, 4294967040  ;;  %s298_s1 = scalar_lea.sflag [#allocation8], %s1230_s25  ;;  %s301_s16 = scalar_lea.vmem [#allocation7], %s768_s27 }
  0x51   : > { %1013 = dma.done.wait (%p1163_p13), %s298_s1, 256  }
  0x52   : > { %1015 = vsyncadd (%p1163_p13), %s298_s1, 4294967040  ;;  %s338_s15 = sshra.s32 %s1038_s9, 7  ;;  %s343_s22 = sand.u32 127, %s1038_s9  ;;  %v1055_v0 = vmov 0.0   ;;  %v1056_v1 = vmov 0   ;;  %v351_v2 = vld [vmem:[%s292_s24 + $0x8] sm:$0xff] }
  0x53   : > { %s337_s14 = sld [smem:[#allocation3 + %s1038_s9]]  ;;  %s783_s19 = sshll.u32 %s338_s15, 7  ;;  %473 = vmatprep.mubr.f32.mxu0 %v1055_v0  ;;  %874 = vset.pattern.permute.xlu0 %v1056_v1  ;;  %v353_v3 = vld [vmem:[%s301_s16 + $0x8] sm:$0xff]  ;;  %v350_v5 = vld [vmem:[%s292_s24] sm:$0xff]  ;;  %vm396_vm0 = vcmask 64512   ;;  %v1057_v27 = vmov 1  }
  0x54   : > { %s784_s28 = sadd.s32 128, %s783_s19  ;;  %s786_s13 = sadd.s32 256, %s783_s19  ;;  %875 = vset.pattern.permute.xlu1 %v1056_v1  ;;  %614 = vmatprep.mubr.f32.mxu1 %v1055_v0  ;;  %v352_v7 = vld [vmem:[%s301_s16] sm:$0xff]  ;;  %v375_v11 = vld [vmem:[%s1343_s4 + $0x18] sm:$0xff]  ;;  %v373_v13 = vld [vmem:[%s1343_s4 + $0x8] sm:$0xff]  ;;  %vm546_vm1 = vcmask 261120  }
  0x55   : > { %s344_s11 = sadd.s32 %s784_s28, %s343_s22  ;;  %s348_s18 = sadd.s32 %s786_s13, %s343_s22  ;;  %393 = vperm.xlu0 %874, %v375_v11   ;;  %v374_v18 = vld [vmem:[%s1343_s4 + $0x10] sm:$0xff]  ;;  %383 = vperm.xlu1 %875, %v373_v13   ;;  %v372_v20 = vld [vmem:[%s1343_s4] sm:$0xff]  ;;  %v369_v26 = vld [vmem:[%s1342_s3 + $0x8] sm:$0xff] }
  0x56   : > { %s345_s17 = sld [smem:[#allocation3 + %s344_s11]]  ;;  %v368_v23 = vld [vmem:[%s1342_s3] sm:$0xff]  ;;  %v370_v30 = vld [vmem:[%s1342_s3 + $0x10] sm:$0xff]  ;;  %v371_v31 = vld [vmem:[%s1342_s3 + $0x18] sm:$0xff]  ;;  %s770_s16 = sshll.u32 %s1230_s25, 3 }
  0x57   : > { %s349_s20 = sld [smem:[#allocation3 + %s348_s18]]  ;;  %v540_v32 = vld [vmem:[%s1345_s6] sm:$0xff]  ;;  %s779_s22 = sshll.u32 %s1038_s9, 1 }
  0x58   : > { %s334_s28 = scalar_lea.vmem [#allocation9], %s770_s16  ;;  %s628_s9 = scalar_lea.sflag [#allocation6], %s1230_s25 }
  0x59   : > { %v354_v4 = vstv %s337_s14  ;;  %388 = vperm.xlu0 %874, %v374_v18   ;;  %378 = vperm.xlu1 %875, %v372_v20   ;;  %s639_s14 = sadd.s32 %s1034_s8, %s779_s22  ;;  %s643_s13 = sshll.u32 %s334_s28, 4  ;;  %s644_s13 = int_to_ptr.vmem [resolvable:$true] %s643_s13 }
  0x5a   : > { %v1246_v6 = vmul.f32 %v354_v4, %v353_v3  ;;  %v356_v8 = vmul.f32 %v354_v4, %v351_v2  ;;  %v355_v9 = vmul.f32 %v354_v4, %v350_v5  ;;  %v1248_v10 = vmul.f32 %v354_v4, %v352_v7  ;;  %s780_s19 = sshll.u32 %s639_s14, 7  ;;  %s1058_s8 = smov [#allocation9]  }
  0x5b   : > { %s952_s27 = sshll.u32 %s1058_s8, 4  ;;  %s953_s27 = int_to_ptr.vmem [resolvable:$false] %s952_s27 }
  0x5c   : > { %v357_v12 = vstv %s345_s17  ;;  %s641_s17 = scalar_lea.hbm %s1346_s7, %s780_s19  ;;  %s954_s23 = scalar_lea.vmem %s953_s27, 256 }
  0x5d   : > { %v359_v14 = vmul.f32 %v357_v12, %v353_v3  ;;  %v1256_v15 = vmul.f32 %v357_v12, %v351_v2  ;;  %v358_v16 = vmul.f32 %v357_v12, %v352_v7  ;;  %v1258_v17 = vmul.f32 %v357_v12, %v350_v5  ;;  %877 = vset.pattern.permute.xlu0 %v1057_v27  ;;  %p955_p4 = scmp.lt.s32.totalorder %s644_s13, %s953_s27 }
  0x5e   : > { %v498_v19 = vstv %s349_s20  ;;  %876 = vset.pattern.permute.xlu1 %v1057_v27  ;;  %s948_s20 = scalar_lea.vmem %s644_s13, 128 }
  0x5f   : > { %v361_v21 = vadd.f32 %v359_v14, %v356_v8  ;;  %v360_v22 = vadd.f32 %v358_v16, %v355_v9  ;;  %v501_v24 = vmul.f32 %v498_v19, %v374_v18  ;;  %v502_v25 = vmul.f32 %v498_v19, %v375_v11  ;;  %v539_v11 = vld [vmem:[%s1344_s5] sm:$0xff]  ;;  %p949_p13 = scmp.ne.s32.totalorder %s644_s13, %s948_s20  ;;  %p956_p10 = scmp.lt.s32.totalorder %s954_s23, %s948_s20 }
  0x60   : > { %v499_v28 = vmul.f32 %v498_v19, %v372_v20  ;;  %v500_v29 = vmul.f32 %v498_v19, %v373_v13  ;;  %v366_v33 = vsub.f32 %v1248_v10, %v1258_v17  ;;  %v367_v12 = vsub.f32 %v1246_v6, %v1256_v15 }
  0x61   : > { %439 = vmatprep.subr.mxu0 %v361_v21  ;;  %515 = vperm.xlu0 %877, %v501_v24   ;;  %p950_p5 = pnand %p949_p13, %p1167_p0  ;;  %p957_p11 = por %p956_p10, %p955_p4 }
  0x62   : > { %440 = vmatpush1.msra.mxu0 %v360_v22  ;;  %520 = vperm.xlu1 %876, %v502_v25  }
  0x63   : > { %773 = vmatmul.mubr.msk.f32.vlgmr.msra.gmra.mxu0 %vm396_vm0, %v368_v23  ;;  %p951_p9 = pneg %p950_p5 }
  0x64   : > { %479 = vmatprep.mubr.f32.mxu0 %v1055_v0 }
  0x65   : > { %505 = vperm.xlu0 %877, %v499_v28   ;;  %p958_p8 = pnand %p957_p11, %p951_p9 }
  0x66   : > { %510 = vperm.xlu1 %876, %v500_v29  }
  0x67   : > { %774 = vmatmul.mubr.msk.f32.gmra.mxu0 %vm396_vm0, %v369_v26 }
  0x68   : > { %485 = vmatprep.mubr.f32.mxu0 %v1055_v0 }
  0x69   : > { %879 = vset.pattern.permute.xlu0 %v1056_v1 }
  0x6a   : > { %878 = vset.pattern.permute.xlu1 %v1056_v1 }
  0x6b   : > { %775 = vmatmul.mubr.msk.f32.gmra.mxu0 %vm396_vm0, %v370_v30  ;;  %543 = vperm.xlu1 %878, %v540_v32  }
  0x6c   : > { %491 = vmatprep.mubr.f32.mxu0 %v1055_v0 }
  0x6f   : > { %776 = vmatmul.mubr.msk.f32.gmra.mxu0 %vm396_vm0, %v371_v31 }
  0xd0   : > { %v384_v34 = vpop.permute.xlu1 %383  ;;  %v394_v36 = vpop.permute.xlu0 %393 }
  0xd4   : > { %v379_v39 = vpop.permute.xlu1 %378  ;;  %v389_v41 = vpop.permute.xlu0 %388 }
  0xdc   : > { %v516_v46 = vpop.permute.xlu0 %515 }
  0xdd   : > { %v521_v44 = vpop.permute.xlu1 %520 }
  0xe0   : > { %v506_v61 = vpop.permute.xlu0 %505 }
  0xe1   : > { %v511_v56 = vpop.permute.xlu1 %510 }
  0xe6   : > { %v544_v13 = vpop.permute.xlu1 %543 }
 0x123   : > { %v475_v35 = vpop.f32.mrf.mxu0 }
 0x124   : > { %v476_v59 = vadd.f32 %v475_v35, %v379_v39 }
 0x125   : > { %v477_v37 = vpop.f32.mrf.mxu0 }
 0x126   : > { %v478_v55 = vadd.f32 %v477_v37, %v379_v39  ;;  %v523_v4 = vadd.f32 %v506_v61, %v476_v59 }
 0x127   : > { %v481_v38 = vpop.f32.mrf.mxu0 }
 0x128   : > { %v482_v53 = vadd.f32 %v481_v38, %v384_v34  ;;  %v524_v2 = vadd.f32 %v506_v61, %v478_v55  ;;  %v531_v10 = vmax.f32 %v523_v4, 0.0 }
 0x129   : > { %v483_v40 = vpop.f32.mrf.mxu0 }
 0x12a   : > { %v484_v51 = vadd.f32 %v483_v40, %v384_v34  ;;  %v525_v0 = vadd.f32 %v511_v56, %v482_v53  ;;  %v532_v9 = vmax.f32 %v524_v2, 0.0 }
 0x12b   : > { %v487_v42 = vpop.f32.mrf.mxu0 }
 0x12c   : > { %v488_v49 = vadd.f32 %v487_v42, %v389_v41  ;;  %v526_v62 = vadd.f32 %v511_v56, %v484_v51  ;;  %v533_v8 = vmax.f32 %v525_v0, 0.0 }
 0x12d   : > { %v489_v43 = vpop.f32.mrf.mxu0 }
 0x12e   : > { %v490_v47 = vadd.f32 %v489_v43, %v389_v41  ;;  %v527_v60 = vadd.f32 %v516_v46, %v488_v49  ;;  %v534_v7 = vmax.f32 %v526_v62, 0.0 }
 0x12f   : > { %v493_v45 = vpop.f32.mrf.mxu0 }
 0x130   : > { %v494_v48 = vadd.f32 %v493_v45, %v394_v36  ;;  %v528_v57 = vadd.f32 %v516_v46, %v490_v47  ;;  %v535_v5 = vmax.f32 %v527_v60, 0.0 }
 0x131   : > { %v495_v50 = vpop.f32.mrf.mxu0 }
 0x132   : > { %v496_v52 = vadd.f32 %v495_v50, %v394_v36  ;;  %v529_v54 = vadd.f32 %v521_v44, %v494_v48  ;;  %v536_v3 = vmax.f32 %v528_v57, 0.0 }
 0x134   : > { %v530_v58 = vadd.f32 %v521_v44, %v496_v52  ;;  %v537_v1 = vmax.f32 %v529_v54, 0.0 }
 0x136   : > { %v538_v63 = vmax.f32 %v530_v58, 0.0 }
 0x138   : > { %574 = vmatprep.subr.mxu1 %v538_v63 }
 0x139   : > { %575 = vmatpush1.msra.mxu1 %v537_v1 }
 0x13a   : > { %576 = vmatprep.subr.mxu1 %v536_v3 }
 0x13b   : > { %577 = vmatpush1.msra.mxu1 %v535_v5 }
 0x13c   : > { %578 = vmatprep.subr.mxu1 %v534_v7 }
 0x13d   : > { %579 = vmatpush1.msra.mxu1 %v533_v8 }
 0x13e   : > { %580 = vmatprep.subr.mxu1 %v532_v9 }
 0x13f   : > { %581 = vmatpush1.msra.mxu1 %v531_v10 }
 0x140   : > { %777 = vmatmul.mubr.msk.f32.vlgmr.msra.gmra.mxu1 %vm546_vm1, %v539_v11 }
 0x200   : > { %v616_v14 = vpop.f32.mrf.mxu1 }
 0x201   : > { %v617_v16 = vadd.f32 %v616_v14, %v544_v13 }
 0x202   : > { %v618_v17 = vpop.f32.mrf.mxu1 }
 0x203   : > { %v621_v18 = vsub.f32 %v617_v16, %v366_v33  ;;  %v619_v19 = vadd.f32 %v618_v17, %v544_v13 }
 0x205   : > { %v622_v20 = vsub.f32 %v619_v19, %v367_v12  ;;  %v623_v21 = vmul.f32 %v621_v18, %v621_v18 }
 0x207   : > { %v624_v22 = vmul.f32 %v622_v20, %v622_v20 }
 0x209   : > { %v625_v23 = vadd.f32 %v624_v22, %v623_v21 }
 0x20b   : > { %626 = vst [vmem:[%s334_s28] sm:$0xff] %v625_v23 }
 0x20c   : > { %961 = shalt.err (!%p958_p8)
}
 0x20d   : > { %s962_s1 = scalar_lea.hbm %s641_s17, 128  ;;  %s966_s24 = scalar_lea.hbm %s1346_s7, 1024 }
 0x20e   : > { %p963_p12 = scmp.ne.s32.totalorder %s641_s17, %s962_s1  ;;  %p967_p1 = scmp.lt.s32.totalorder %s641_s17, %s1346_s7 }
 0x20f   : > { %p968_p2 = scmp.lt.s32.totalorder %s966_s24, %s962_s1 }
 0x210   : > { %p964_p6 = pnand %p963_p12, %p1167_p0 }
 0x211   : > { %p969_p13 = por %p968_p2, %p967_p1 }
 0x212   : > { %p965_p7 = pneg %p964_p6 }
 0x214   : > { %p970_p5 = pnand %p969_p13, %p965_p7 }
 0x216   : > { %973 = shalt.err (!%p970_p5)
}
 0x217   : > { %791 = dma.vmem_to_hbm [thread:$0]  (%p1167_p0), %s644_s13, 128, %s641_s17, %s628_s9  }
 0x218 PF: > { %p805_p9 = scmp.ge.s32.totalorder %s1050_s12, 2  ;;  %s655_s19 = sand.u32 1, %s1022_s0  }
 0x219   : > { %s656_s28 = scalar_lea.sflag [#allocation6], %s655_s19 }
 0x21a   : > { %p801_p4 = pnand %p805_p9, %p1173_p3 }
 0x21c   : > { %p802_p10 = pneg %p801_p4 }
 0x21e   : > { %1017 = dma.done.wait (%p802_p10), %s656_s28, 128  }
 0x21f   : > { %1019 = vsyncadd (%p802_p10), %s656_s28, 4294967168  ;;  %s32_s12 = sadd.s32 1, %s1050_s12   ;;  %s1364_s9 = sld [smem:[#allocation14_spill]] }
 0x220   : > { %p29_p11 = scmp.ge.s32.totalorder %s32_s12, 10   ;;  %s1365_s21 = sld [smem:[#allocation15_spill]] }
 0x221   : > { %s1366_s11 = sld [smem:[#allocation16_spill]]  ;;  %s1367_s0 = smov %s1026_s29 }
 0x222   : > { %s1368_s29 = smov %s1030_s30  ;;  %s1369_s30 = smov %s1182_s26 }
 0x223   : > { %s1370_s8 = smov %s1042_s10  ;;  %31 = sbr.rel (!%p29_p11) target bundleno = 24 (0x18), region = 102 }
 0x226   : > { %s1371_s10 = smov %s1365_s21 }
 0x228   :  { %661 = vsyncpa [#allocation5], 1 }
 0x229   :  { %663 = vsyncpa [#allocation5 + $0x1], 1 }
 0x22a   :  { %664 = vsyncpa [#allocation8], 1 }
 0x22b   :  { %666 = vsyncpa [#allocation8 + $0x1], 1 }
 0x22c   :  { %667 = vsyncpa [#allocation6], 1 }
 0x22d   :  { %669 = vsyncpa [#allocation6 + $0x1], 1 }

</bundles_post_ra>
